<compile_context>
chip_gen: v6e
topology: v6e:2x2x1
jax: 0.10.0
libtpu: 0.0.40
codegen_flags: <defaults>
</compile_context>

<pallas_src>
import functools

import jax
import jax.numpy as jnp
from jax.experimental import pallas as pl
from jax.experimental.pallas import tpu as pltpu


# ---------------------------------------------------------------------------
# Generation-aware budgets
# ---------------------------------------------------------------------------
def _hw_budgets():
    """Returns (per-step slab budget bytes, vmem_limit_bytes)."""
    vmem_cap = 64 * 1024 * 1024  # conservative default (v7x has the smallest VMEM)
    try:
        info = pltpu.get_tpu_info()
        vmem_cap = int(getattr(info, "vmem_capacity_bytes", vmem_cap))
    except Exception:
        pass
    # Leave headroom under physical VMEM for compiler scratch.
    vmem_limit = min((vmem_cap * 3) // 4, 96 * 1024 * 1024)
    # Input + output tiles are double-buffered (~4 tile-sized buffers) + headroom.
    slab_budget = max(1 << 20, vmem_limit // 8)
    return slab_budget, vmem_limit


def _pick_batch_block(N, per_image_bytes, slab_budget):
    """Images per grid step for the fused path (None -> does not fit VMEM)."""
    if per_image_bytes > slab_budget:
        return None
    nb_max = max(1, slab_budget // per_image_bytes)
    # Keep >= 2 grid steps when N >= 2 so both v7x TensorCores get work.
    nb_cap = max(1, N // 2) if N >= 2 else 1
    nb_max = min(nb_max, nb_cap, N)
    for nb in range(nb_max, 0, -1):
        if N % nb == 0:
            return nb
    return 1


def _choose_tile_s(S, C, slab_budget_bytes):
    """Spatial tile (multiple of 128) and padded S for the two-phase fallback."""
    bytes_per_col = C * 4
    max_tile = (slab_budget_bytes // bytes_per_col) // 128 * 128
    # Cap the lane-fold unroll in phase 1 (tile_s // 128 VPU adds per step).
    max_tile = max(128, min(max_tile, 64 * 128))
    if S % 128 == 0:
        t = min(S, max_tile)
        while t >= 128:
            if S % t == 0:
                return t, S
            t -= 128
        return 128, S
    # Non-128-aligned spatial size: pad S up to a multiple of the tile.
    tile = min(max_tile, ((S + 127) // 128) * 128)
    s_pad = ((S + tile - 1) // tile) * tile
    return tile, s_pad


# ---------------------------------------------------------------------------
# FUSED kernel: whole SCSE on a resident (Nb, C, S) slab.  grid = (N // Nb,)
#   out = x * (sigmoid(W2 @ relu(W1 @ mean_S(x) + b1) + b2) + sigmoid(ws·x + bs))
# ---------------------------------------------------------------------------
def _scse_fused_kernel(x_ref, w1t_ref, b1_ref, w2t_ref, b2_ref, ws_ref, bs_ref,
                       o_ref):
    x = x_ref[...]                                            # (Nb, C, S)

    # --- cSE: channel mean -> squeeze/excite -> sigmoid ---
    mean_c = jnp.mean(x, axis=2)                              # (Nb, C)
    z1 = jnp.dot(mean_c, w1t_ref[...],
                 preferred_element_type=jnp.float32) + b1_ref[...]   # (Nb, Cr)
    z1 = jnp.maximum(z1, 0.0)                                 # ReLU
    z2 = jnp.dot(z1, w2t_ref[...],
                 preferred_element_type=jnp.float32) + b2_ref[...]   # (Nb, C)
    c_scale = jax.nn.sigmoid(z2)[:, :, None]                  # (Nb, C, 1)

    # --- sSE: spatial gate via VPU multiply + sublane reduce (keeps MXU free) ---
    s_pre = jnp.sum(ws_ref[...] * x, axis=1, keepdims=True) + bs_ref[0]  # (Nb,1,S)
    s_scale = jax.nn.sigmoid(s_pre)

    # --- fused combine: x*cSE + x*sSE == x*(cSE + sSE) ---
    o_ref[...] = x * (c_scale + s_scale)


# ---------------------------------------------------------------------------
# Fallback phase 1: per-image channel-excitation scale (N, C, 1).
# Lane-wide (C, 128) scratch accumulator; cross-lane reduce only at finalize.
# ---------------------------------------------------------------------------
def _cse_scale_kernel(x_ref, w1_ref, b1_ref, w2_ref, b2_ref, cs_ref, acc_ref,
                      *, inv_s, n_fold):
    s_idx = pl.program_id(1)

    @pl.when(s_idx == 0)
    def _init():
        acc_ref[...] = jnp.zeros_like(acc_ref)

    # Fold tile_s lanes into 128 with VPU adds only (no XLU, no narrow store).
    part = x_ref[0, :, 0:128]
    for j in range(1, n_fold):
        part = part + x_ref[0, :, j * 128:(j + 1) * 128]
    acc_ref[...] += part

    @pl.when(s_idx == pl.num_programs(1) - 1)
    def _finalize():
        mean_c = jnp.sum(acc_ref[...], axis=1, keepdims=True) * inv_s       # (C, 1)
        z1 = jnp.dot(w1_ref[...], mean_c,
                     preferred_element_type=jnp.float32) + b1_ref[...]      # (Cr, 1)
        z1 = jnp.maximum(z1, 0.0)
        z2 = jnp.dot(w2_ref[...], z1,
                     preferred_element_type=jnp.float32) + b2_ref[...]      # (C, 1)
        cs_ref[0] = jax.nn.sigmoid(z2)


# ---------------------------------------------------------------------------
# Fallback phase 2 (hot, memory-bound): spatial gate + fused combine.
# ---------------------------------------------------------------------------
def _scse_gate_kernel(x_ref, cs_ref, ws_ref, bs_ref, o_ref):
    x = x_ref[0]                             # (C, TILE_S)
    c_scale = cs_ref[0]                      # (C, 1)    per-sublane broadcast
    ws_col = ws_ref[0]                       # (C, 1)
    # Spatial gate: VPU multiply + sublane sum (MXU slot stays free).
    s_pre = jnp.sum(ws_col * x, axis=0, keepdims=True) + bs_ref[0]   # (1, TILE_S)
    s_scale = jax.nn.sigmoid(s_pre)          # per-lane broadcast
    o_ref[0] = x * (c_scale + s_scale)       # single broadcast-add + multiply


# ---------------------------------------------------------------------------
# Wrapper
# ---------------------------------------------------------------------------
def scse_attention(x_nchw, params, *, tile_s=None, force_two_phase=False):
    """x_nchw: (N, C, H, W) float32. params: dict of SCSE weights."""
    N, C, H, W = x_nchw.shape
    S = H * W
    Cr = params["w1"].shape[0]
    slab_budget, vmem_limit = _hw_budgets()

    # NCHW -> (N, C, S): free reshape, no transpose / extra HBM pass.
    x = x_nchw.reshape(N, C, S).astype(jnp.float32)
    per_image_bytes = C * S * 4

    bs = params["bs"].reshape(1).astype(jnp.float32)         # SMEM scalar
    ws3 = params["ws"].reshape(1, C, 1).astype(jnp.float32)  # (1, C, 1)

    nb = None if force_two_phase else _pick_batch_block(N, per_image_bytes,
                                                        slab_budget)

    # ------------------------------ fused path ------------------------------
    if nb is not None:
        w1t = params["w1"].reshape(Cr, C).T.astype(jnp.float32)   # (C, Cr)
        b1r = params["b1"].reshape(1, Cr).astype(jnp.float32)     # (1, Cr)
        w2t = params["w2"].reshape(C, Cr).T.astype(jnp.float32)   # (Cr, C)
        b2r = params["b2"].reshape(1, C).astype(jnp.float32)      # (1, C)

        out = pl.pallas_call(
            _scse_fused_kernel,
            out_shape=jax.ShapeDtypeStruct((N, C, S), jnp.float32),
            grid_spec=pltpu.PrefetchScalarGridSpec(
                num_scalar_prefetch=0,
                grid=(N // nb,),
                in_specs=[
                    pl.BlockSpec((nb, C, S), lambda n: (n, 0, 0)),
                    pl.BlockSpec((C, Cr), lambda n: (0, 0)),
                    pl.BlockSpec((1, Cr), lambda n: (0, 0)),
                    pl.BlockSpec((Cr, C), lambda n: (0, 0)),
                    pl.BlockSpec((1, C), lambda n: (0, 0)),
                    pl.BlockSpec((1, C, 1), lambda n: (0, 0, 0)),
                    pl.BlockSpec(memory_space=pltpu.MemorySpace.SMEM),
                ],
                out_specs=pl.BlockSpec((nb, C, S), lambda n: (n, 0, 0)),
            ),
            compiler_params=pltpu.CompilerParams(
                dimension_semantics=("parallel",),
                vmem_limit_bytes=vmem_limit,
            ),
        )(x, w1t, b1r, w2t, b2r, ws3, bs)
        return out.reshape(N, C, H, W)

    # --------------------------- two-phase fallback --------------------------
    if tile_s is None:
        tile_s, s_pad = _choose_tile_s(S, C, slab_budget)
    else:
        assert tile_s % 128 == 0, "tile_s must be a multiple of 128"
        s_pad = ((S + tile_s - 1) // tile_s) * tile_s
    if s_pad != S:
        # Zero columns do not perturb the mean (divide by true S) and are
        # sliced off below.  Extra HBM pass only on this rare path.
        x = jnp.pad(x, ((0, 0), (0, 0), (0, s_pad - S)))
    n_s = s_pad // tile_s
    n_fold = tile_s // 128

    w1 = params["w1"].reshape(Cr, C).astype(jnp.float32)   # (Cr, C)
    b1 = params["b1"].reshape(Cr, 1).astype(jnp.float32)   # (Cr, 1)
    w2 = params["w2"].reshape(C, Cr).astype(jnp.float32)   # (C, Cr)
    b2 = params["b2"].reshape(C, 1).astype(jnp.float32)    # (C, 1)

    # ---- Phase 1: c_scale (N, C, 1) ----
    c_scale = pl.pallas_call(
        functools.partial(_cse_scale_kernel, inv_s=1.0 / S, n_fold=n_fold),
        out_shape=jax.ShapeDtypeStruct((N, C, 1), jnp.float32),
        grid_spec=pltpu.PrefetchScalarGridSpec(
            num_scalar_prefetch=0,
            grid=(N, n_s),
            in_specs=[
                pl.BlockSpec((1, C, tile_s), lambda n, s: (n, 0, s)),
                pl.BlockSpec((Cr, C), lambda n, s: (0, 0)),
                pl.BlockSpec((Cr, 1), lambda n, s: (0, 0)),
                pl.BlockSpec((C, Cr), lambda n, s: (0, 0)),
                pl.BlockSpec((C, 1), lambda n, s: (0, 0)),
            ],
            out_specs=pl.BlockSpec((1, C, 1), lambda n, s: (n, 0, 0)),
            scratch_shapes=[pltpu.VMEM((C, 128), jnp.float32)],
        ),
        compiler_params=pltpu.CompilerParams(
            dimension_semantics=("parallel", "arbitrary"),
            vmem_limit_bytes=vmem_limit,
        ),
    )(x, w1, b1, w2, b2)

    # ---- Phase 2: gated combine (hot path) ----
    out = pl.pallas_call(
        _scse_gate_kernel,
        out_shape=jax.ShapeDtypeStruct((N, C, s_pad), jnp.float32),
        grid_spec=pltpu.PrefetchScalarGridSpec(
            num_scalar_prefetch=0,
            grid=(N, n_s),
            in_specs=[
                pl.BlockSpec((1, C, tile_s), lambda n, s: (n, 0, s)),
                pl.BlockSpec((1, C, 1), lambda n, s: (n, 0, 0)),
                pl.BlockSpec((1, C, 1), lambda n, s: (0, 0, 0)),
                pl.BlockSpec(memory_space=pltpu.MemorySpace.SMEM),
            ],
            out_specs=pl.BlockSpec((1, C, tile_s), lambda n, s: (n, 0, s)),
        ),
        compiler_params=pltpu.CompilerParams(
            dimension_semantics=("parallel", "parallel"),
            vmem_limit_bytes=vmem_limit,
        ),
    )(x, c_scale, ws3, bs)

    if s_pad != S:
        out = out[:, :, :S]
    return out.reshape(N, C, H, W)


# ---------------------------------------------------------------------------
# Pure-JAX reference & params
# ---------------------------------------------------------------------------
def scse_reference(x_nchw, params):
    """Pure-JAX reference mirroring the PyTorch SCSEModule forward."""
    N, C, H, W = x_nchw.shape
    Cr = params["w1"].shape[0]
    pooled = jnp.mean(x_nchw, axis=(2, 3))                      # (N, C)
    z1 = jnp.maximum(pooled @ params["w1"].reshape(Cr, C).T
                     + params["b1"][None, :], 0.0)              # (N, Cr)
    z2 = jax.nn.sigmoid(z1 @ params["w2"].reshape(C, Cr).T
                        + params["b2"][None, :])                # (N, C)
    cse = x_nchw * z2[:, :, None, None]
    s = jnp.einsum("nchw,c->nhw", x_nchw, params["ws"].reshape(C)) + params["bs"][0]
    sse = x_nchw * jax.nn.sigmoid(s)[:, None, :, :]
    return cse + sse


def init_params(key, in_channels, reduction=16):
    Cr = in_channels // reduction
    k = jax.random.split(key, 6)
    return {
        # Conv2d(C, Cr, 1) weight: (Cr, C, 1, 1) -> stored (Cr, C)
        "w1": 0.1 * jax.random.normal(k[0], (Cr, in_channels), jnp.float32),
        "b1": 0.1 * jax.random.normal(k[1], (Cr,), jnp.float32),
        # Conv2d(Cr, C, 1) weight: (C, Cr, 1, 1) -> stored (C, Cr)
        "w2": 0.1 * jax.random.normal(k[2], (in_channels, Cr), jnp.float32),
        "b2": 0.1 * jax.random.normal(k[3], (in_channels,), jnp.float32),
        # Conv2d(C, 1, 1) weight: (1, C, 1, 1) -> stored (1, C)
        "ws": 0.1 * jax.random.normal(k[4], (1, in_channels), jnp.float32),
        "bs": 0.1 * jax.random.normal(k[5], (1,), jnp.float32),
    }


if __name__ == "__main__":
    key = jax.random.PRNGKey(0)
    kx, kx2, kp = jax.random.split(key, 3)

    N, C, H, W = 2, 32, 32, 32          # reduction=16 -> Cr=2; S = 1024
    x = jax.random.normal(kx, (N, C, H, W), jnp.float32)
    params = init_params(kp, C, reduction=16)
    ref = scse_reference(x, params)

    # Fused single-pass path (preferred).
    out_fused = jax.block_until_ready(scse_attention(x, params))
    assert out_fused.shape == (N, C, H, W)
    assert jnp.allclose(out_fused, ref, atol=1e-4, rtol=1e-4), "mismatch (fused)"

    # Two-phase fallback with explicit spatial tiling.
    out_tiled = jax.block_until_ready(
        scse_attention(x, params, force_two_phase=True, tile_s=256))
    assert jnp.allclose(out_tiled, ref, atol=1e-4, rtol=1e-4), "mismatch (two-phase)"

    # Non-128-aligned spatial size: fused path and padded fallback path.
    x2 = jax.random.normal(kx2, (N, C, 10, 10), jnp.float32)
    ref2 = scse_reference(x2, params)
    out2_fused = jax.block_until_ready(scse_attention(x2, params))
    out2_fb = jax.block_until_ready(scse_attention(x2, params, force_two_phase=True))
    assert jnp.allclose(out2_fused, ref2, atol=1e-4, rtol=1e-4), "mismatch (fused, S=100)"
    assert jnp.allclose(out2_fb, ref2, atol=1e-4, rtol=1e-4), "mismatch (padded fallback)"

    print("KERNEL_OK")
</pallas_src>

<mosaic_0001>
module attributes {stable_mosaic.version = 11 : i64} {
  func.func @_scse_fused_kernel(%arg0: i32, %arg1: memref<1x32x1024xf32, #tpu.memory_space<vmem>>, %arg2: memref<32x2xf32, #tpu.memory_space<vmem>>, %arg3: memref<1x2xf32, #tpu.memory_space<vmem>>, %arg4: memref<2x32xf32, #tpu.memory_space<vmem>>, %arg5: memref<1x32xf32, #tpu.memory_space<vmem>>, %arg6: memref<1x32x1xf32, #tpu.memory_space<vmem>>, %arg7: memref<1xf32, #tpu.memory_space<smem>>, %arg8: memref<1x32x1024xf32, #tpu.memory_space<vmem>>) attributes {dimension_semantics = [#tpu.dimension_semantics<parallel>], iteration_bounds = array<i64: 2>, scalar_prefetch = 0 : i64, scratch_operands = 0 : i64, tpu.core_type = #tpu.core_type<tc>, window_params = [{transform_indices = @transform_0, window_bounds = array<i64: 1, 32, 1024>}, {pipeline_mode = #tpu.pipeline_mode<synchronous>, transform_indices = @transform_1, window_bounds = array<i64: 32, 2>}, {pipeline_mode = #tpu.pipeline_mode<synchronous>, transform_indices = @transform_2, window_bounds = array<i64: 1, 2>}, {pipeline_mode = #tpu.pipeline_mode<synchronous>, transform_indices = @transform_3, window_bounds = array<i64: 2, 32>}, {pipeline_mode = #tpu.pipeline_mode<synchronous>, transform_indices = @transform_4, window_bounds = array<i64: 1, 32>}, {pipeline_mode = #tpu.pipeline_mode<synchronous>, transform_indices = @transform_5, window_bounds = array<i64: 1, 32, 1>}, {transform_indices = @transform_6, window_bounds = array<i64: 1>}, {transform_indices = @transform_7, window_bounds = array<i64: 1, 32, 1024>}]} {
    %c0 = arith.constant 0 : index
    %c0_0 = arith.constant 0 : index
    %c0_1 = arith.constant 0 : index
    %0 = vector.load %arg1[%c0, %c0_0, %c0_1] : memref<1x32x1024xf32, #tpu.memory_space<vmem>>, vector<1x32x1024xf32>
    %cst = arith.constant dense<0.000000e+00> : vector<1x32xf32>
    %1 = vector.multi_reduction <add>, %0, %cst [2] : vector<1x32x1024xf32> to vector<1x32xf32>
    %cst_2 = arith.constant 1.024000e+03 : f32
    %2 = vector.broadcast %cst_2 : f32 to vector<1x32xf32>
    %3 = arith.divf %1, %2 : vector<1x32xf32>
    %c0_3 = arith.constant 0 : index
    %c0_4 = arith.constant 0 : index
    %4 = vector.load %arg2[%c0_3, %c0_4] : memref<32x2xf32, #tpu.memory_space<vmem>>, vector<32x2xf32>
    %cst_5 = arith.constant dense<0.000000e+00> : vector<1x2xf32>
    %5 = tpu.matmul %3, %4, %cst_5 {dimension_numbers = #tpu.dot_dimension_numbers<[1], [0], [0], [1], [0, 0, 1, 1], [], []>} : vector<1x32xf32>, vector<32x2xf32>, vector<1x2xf32> -> vector<1x2xf32>
    %c0_6 = arith.constant 0 : index
    %c0_7 = arith.constant 0 : index
    %6 = vector.load %arg3[%c0_6, %c0_7] : memref<1x2xf32, #tpu.memory_space<vmem>>, vector<1x2xf32>
    %7 = arith.addf %5, %6 : vector<1x2xf32>
    %cst_8 = arith.constant 0.000000e+00 : f32
    %8 = vector.broadcast %cst_8 : f32 to vector<1x2xf32>
    %9 = arith.maximumf %7, %8 : vector<1x2xf32>
    %c0_9 = arith.constant 0 : index
    %c0_10 = arith.constant 0 : index
    %10 = vector.load %arg4[%c0_9, %c0_10] : memref<2x32xf32, #tpu.memory_space<vmem>>, vector<2x32xf32>
    %cst_11 = arith.constant dense<0.000000e+00> : vector<1x32xf32>
    %11 = tpu.matmul %9, %10, %cst_11 {dimension_numbers = #tpu.dot_dimension_numbers<[1], [0], [0], [1], [0, 0, 1, 1], [], []>} : vector<1x2xf32>, vector<2x32xf32>, vector<1x32xf32> -> vector<1x32xf32>
    %c0_12 = arith.constant 0 : index
    %c0_13 = arith.constant 0 : index
    %12 = vector.load %arg5[%c0_12, %c0_13] : memref<1x32xf32, #tpu.memory_space<vmem>>, vector<1x32xf32>
    %13 = arith.addf %11, %12 : vector<1x32xf32>
    %14 = arith.negf %13 : vector<1x32xf32>
    %15 = math.exp %14 : vector<1x32xf32>
    %cst_14 = arith.constant 1.000000e+00 : f32
    %16 = vector.broadcast %cst_14 : f32 to vector<1x32xf32>
    %17 = arith.addf %16, %15 : vector<1x32xf32>
    %18 = arith.divf %16, %17 : vector<1x32xf32>
    %19 = vector.shape_cast %18 : vector<1x32xf32> to vector<1x32x1xf32>
    %c0_15 = arith.constant 0 : index
    %c0_16 = arith.constant 0 : index
    %c0_17 = arith.constant 0 : index
    %20 = vector.load %arg6[%c0_15, %c0_16, %c0_17] : memref<1x32x1xf32, #tpu.memory_space<vmem>>, vector<1x32x1xf32>
    %21 = vector.broadcast %20 : vector<1x32x1xf32> to vector<1x32x1024xf32>
    %22 = arith.mulf %21, %0 : vector<1x32x1024xf32>
    %cst_18 = arith.constant dense<0.000000e+00> : vector<1x1024xf32>
    %23 = vector.multi_reduction <add>, %22, %cst_18 [1] : vector<1x32x1024xf32> to vector<1x1024xf32>
    %24 = vector.shape_cast %23 : vector<1x1024xf32> to vector<1x1x1024xf32>
    %c0_19 = arith.constant 0 : index
    %25 = memref.load %arg7[%c0_19] : memref<1xf32, #tpu.memory_space<smem>>
    %26 = vector.broadcast %25 : f32 to vector<1x1x1024xf32>
    %27 = arith.addf %24, %26 : vector<1x1x1024xf32>
    %28 = arith.negf %27 : vector<1x1x1024xf32>
    %29 = math.exp %28 : vector<1x1x1024xf32>
    %cst_20 = arith.constant 1.000000e+00 : f32
    %30 = vector.broadcast %cst_20 : f32 to vector<1x1x1024xf32>
    %31 = arith.addf %30, %29 : vector<1x1x1024xf32>
    %32 = arith.divf %30, %31 : vector<1x1x1024xf32>
    %33 = vector.broadcast %19 : vector<1x32x1xf32> to vector<1x32x1024xf32>
    %34 = vector.broadcast %32 : vector<1x1x1024xf32> to vector<1x32x1024xf32>
    %35 = arith.addf %33, %34 : vector<1x32x1024xf32>
    %36 = arith.mulf %0, %35 : vector<1x32x1024xf32>
    %c0_21 = arith.constant 0 : index
    %c0_22 = arith.constant 0 : index
    %c0_23 = arith.constant 0 : index
    %37 = vector.load %arg8[%c0_21, %c0_22, %c0_23] : memref<1x32x1024xf32, #tpu.memory_space<vmem>>, vector<1x32x1024xf32>
    tpu.vector_store %arg8[%c0_21, %c0_22, %c0_23], %36 {strides = array<i32>} : memref<1x32x1024xf32, #tpu.memory_space<vmem>>, vector<1x32x1024xf32>,
    return
  }
  func.func @transform_0(%arg0: i32) -> (i32, i32, i32) {
    %c0_i32 = arith.constant 0 : i32
    %c0_i32_0 = arith.constant 0 : i32
    %c0_i32_1 = arith.constant 0 : i32
    return %arg0, %c0_i32, %c0_i32_0 : i32, i32, i32
  }
  func.func @transform_1(%arg0: i32) -> (i32, i32) {
    %c0_i32 = arith.constant 0 : i32
    %c0_i32_0 = arith.constant 0 : i32
    %c0_i32_1 = arith.constant 0 : i32
    return %c0_i32, %c0_i32_0 : i32, i32
  }
  func.func @transform_2(%arg0: i32) -> (i32, i32) {
    %c0_i32 = arith.constant 0 : i32
    %c0_i32_0 = arith.constant 0 : i32
    %c0_i32_1 = arith.constant 0 : i32
    return %c0_i32, %c0_i32_0 : i32, i32
  }
  func.func @transform_3(%arg0: i32) -> (i32, i32) {
    %c0_i32 = arith.constant 0 : i32
    %c0_i32_0 = arith.constant 0 : i32
    %c0_i32_1 = arith.constant 0 : i32
    return %c0_i32, %c0_i32_0 : i32, i32
  }
  func.func @transform_4(%arg0: i32) -> (i32, i32) {
    %c0_i32 = arith.constant 0 : i32
    %c0_i32_0 = arith.constant 0 : i32
    %c0_i32_1 = arith.constant 0 : i32
    return %c0_i32, %c0_i32_0 : i32, i32
  }
  func.func @transform_5(%arg0: i32) -> (i32, i32, i32) {
    %c0_i32 = arith.constant 0 : i32
    %c0_i32_0 = arith.constant 0 : i32
    %c0_i32_1 = arith.constant 0 : i32
    %c0_i32_2 = arith.constant 0 : i32
    return %c0_i32, %c0_i32_0, %c0_i32_1 : i32, i32, i32
  }
  func.func @transform_6(%arg0: i32) -> i32 {
    %c0_i32 = arith.constant 0 : i32
    %c0_i32_0 = arith.constant 0 : i32
    return %c0_i32 : i32
  }
  func.func @transform_7(%arg0: i32) -> (i32, i32, i32) {
    %c0_i32 = arith.constant 0 : i32
    %c0_i32_0 = arith.constant 0 : i32
    %c0_i32_1 = arith.constant 0 : i32
    return %arg0, %c0_i32, %c0_i32_0 : i32, i32, i32
  }
}

</mosaic_0001>

<bundles_post_ra>
// kernel: tpu_custom_call.1
= control target key start
LH: loop header
LB: loop body
LE: loop exit
PB: predicated region body
PF: predicated region fallthrough
CT: control target
= control target key end

     0   :  { %s1711_s0 = inlined_call_operand.hbm [shape: f32[2,32,1024], index: 0, kind: input, shape index: {}]   ;;  %s1712_s1 = inlined_call_operand.vmem [shape: f32[32,2], index: 1, kind: input, shape index: {}]   ;;  %s1713_s2 = inlined_call_operand.vmem [shape: f32[1,2], index: 2, kind: input, shape index: {}]   ;;  %s1714_s3 = inlined_call_operand.vmem [shape: f32[2,32], index: 3, kind: input, shape index: {}]   ;;  %s1715_s4 = inlined_call_operand.vmem [shape: f32[1,32], index: 4, kind: input, shape index: {}]   ;;  %s1716_s5 = inlined_call_operand.vmem [shape: f32[1,32,1], index: 5, kind: input, shape index: {}]   ;;  %s1717_s6 = inlined_call_operand.<no memory space> [shape: f32[1], index: 6, kind: input, shape index: {}]   ;;  %s1718_s7 = inlined_call_operand.hbm [shape: f32[2,32,1024], index: 7, kind: output, shape index: {}]  }
   0x1   :  { %12 = sst [smem:[#allocation2]] %s1717_s6 }
   0x2   :  { %13 = vsyncpa [#allocation4], 0 }
   0x3   :  { %15 = vsyncpa [#allocation4 + $0x1], 0 }
   0x4   :  { %16 = vsyncpa [#allocation5], 0 }
   0x5   :  { %18 = vsyncpa [#allocation5 + $0x1], 0  ;;  %s1243_s26 = smov 0   ;;  %s1245_s27 = smov 0  }
   0x6   :  { %s1247_s28 = smov 0   ;;  %s1249_s29 = smov 0  }
   0x7 LB: > { %s1264_s6 = sadd.s32 4294967295, %s1189_s29   ;;  %s955_s30 = sadd.s32 4294967294, %s1189_s29   ;;  %s1189_s29 = sphi %s1249_s29, %s1739_s29   ;;  %s1185_s28 = sphi %s1247_s28, %s1738_s28   ;;  %s1181_s27 = sphi %s1245_s27, %s1737_s27   ;;  %s1177_s26 = sphi %s1243_s26, %s1736_s26  }
   0x8   : > { %s1268_s8 = sadd.s32 1, %s1189_s29   ;;  %s31_s9 = sadd.s32 1, %s1185_s28 }
   0x9   : > { %s28_s10 = ssub.s32 %s1189_s29, %s1268_s8  ;;  %p38_p0 = scmp.ne.s32.totalorder %s1185_s28, %s1181_s27 }
   0xa   : > { %p29_p1 = scmp.eq.s32.totalorder %s28_s10, 0  ;;  %p39_p2 = scmp.eq.s32.totalorder %s1189_s29, 0 }
   0xb   : > { %p44_p3 = scmp.ne.s32.totalorder %s1181_s27, %s1177_s26  ;;  %p45_p4 = scmp.eq.s32.totalorder %s1264_s6, 0 }
   0xc   : > { %s1280_s11 = scalar_select %p29_p1, %s1185_s28, %s31_s9  }
   0xd   : > { %p1282_p5 = por %p39_p2, %p38_p0  ;;  %p1286_p6 = por %p45_p4, %p44_p3 }
   0xe   : > { %p194_p7 = scmp.eq.s32.totalorder %s1264_s6, 1  ;;  %p200_p8 = scmp.eq.s32.totalorder %s955_s30, 1 }
   0xf   : > { %s1724_s13 = scalar_select %p1286_p6, 1, 0 }
  0x10   : > { %p1018_p10 = scmp.lt.s32.totalorder %s1189_s29, 2  ;;  %p1293_p11 = por %p194_p7, %p38_p0 }
  0x11   : > { %p1297_p12 = por %p200_p8, %p44_p3  ;;  %s238_s16 = sand.u32 1, %s1185_s28  }
  0x12   : > { %s1725_s14 = scalar_select %p1293_p11, 1, 0 }
  0x13   : > { %s1726_s15 = scalar_select %p1297_p12, 1, 0 }
  0x14   : > { %s981_s17 = sshll.u32 %s1189_s29, 12  ;;  %s958_s18 = sshll.u32 %s238_s16, 8 }
  0x15   : > { %s1306_s21 = scalar_lea.hbm %s1711_s0, %s981_s17  ;;  %s242_s22 = scalar_lea.vmem [#allocation3], %s958_s18 }
  0x16   : > { %s249_s23 = sshll.u32 %s242_s22, 4  ;;  %p1310_p13 = pnand %p1018_p10, %p1282_p5  ;;  %s1314_s23 = int_to_ptr.vmem [resolvable:$true] %s249_s23 }
  0x17   : > { %s1316_s25 = scalar_lea.sflag [#allocation4], %s238_s16  ;;  %s1097_s30 = scalar_lea.hbm %s1306_s21, 4096 }
  0x18   : > { %p1098_p0 = scmp.ne.s32.totalorder %s1306_s21, %s1097_s30  ;;  %p1099_p1 = pneg %p1310_p13 }
  0x19   : > { %s1102_s17 = scalar_lea.hbm %s1711_s0, 8192  ;;  %p1103_p4 = scmp.lt.s32.totalorder %s1306_s21, %s1711_s0 }
  0x1a   : > { %p1100_p2 = pnand %p1099_p1, %p1098_p0  ;;  %p1104_p5 = scmp.lt.s32.totalorder %s1102_s17, %s1097_s30 }
  0x1c   : > { %p1101_p3 = pneg %p1100_p2  ;;  %p1105_p7 = por %p1104_p5, %p1103_p4 }
  0x1e   : > { %p1106_p8 = pnand %p1105_p7, %p1101_p3 }
  0x20   : > { %1109 = shalt.err (!%p1106_p8)
}
  0x21   : > { %s1110_s16 = scalar_lea.vmem %s1314_s23, 4096  ;;  %s1191_s19 = smov [#allocation3]  }
  0x22   : > { %p1111_p10 = scmp.ne.s32.totalorder %s1314_s23, %s1110_s16  ;;  %s1115_s20 = sshll.u32 %s1191_s19, 4  ;;  %s1116_s20 = int_to_ptr.vmem [resolvable:$false] %s1115_s20 }
  0x23   : > { %s1117_s22 = scalar_lea.vmem %s1116_s20, 8192  ;;  %p1118_p2 = scmp.lt.s32.totalorder %s1314_s23, %s1116_s20 }
  0x24   : > { %p1113_p9 = pnand %p1111_p10, %p1099_p1  ;;  %p1119_p12 = scmp.lt.s32.totalorder %s1117_s22, %s1110_s16 }
  0x26   : > { %p1114_p0 = pneg %p1113_p9  ;;  %p1120_p11 = por %p1119_p12, %p1118_p2 }
  0x28   : > { %p1121_p6 = pnand %p1120_p11, %p1114_p0 }
  0x2a   : > { %1124 = shalt.err (!%p1121_p6)
}
  0x2b   : > { %s1192_s30 = smov 1024   ;;  %s1193_s9 = smov 64  }
  0x2c   : > { %1013 = dma.hbm_to_vmem [thread:$0]  (!%p1310_p13), %s1306_s21, 4096, %s1314_s23, %s1316_s25, %s1192_s30, %s1192_s30, %s1193_s9  }
  0x2d   : > { %p961_p9 = scmp.ge.s32.totalorder %s1189_s29, 1  ;;  %p257_p1 = scmp.lt.s32.totalorder %s1189_s29, 3 }
  0x2f   : > { %p258_p3 = pnand %p961_p9, %p257_p1 }
  0x31   : > { %261 = sbr.rel (%p258_p3) target bundleno = 798 (0x31e), region = 48 }
  0x36   : > { %s1340_s10 = sand.u32 1, %s1181_s27   ;;  %p1728_p6 = scmp.ne.s32.totalorder %s1724_s13, 0 }
  0x37   : > { %s962_s17 = sshll.u32 %s1340_s10, 8  ;;  %s264_s12 = scalar_lea.sflag [#allocation4], %s1340_s10 }
  0x38   : > { %s1346_s18 = scalar_lea.vmem [#allocation3], %s962_s17 }
  0x39   : > { %1168 = dma.done.wait (%p1728_p6), %s264_s12, 4096  }
  0x3a   : > { %1170 = vsyncadd (%p1728_p6), %s264_s12, 4294963200  ;;  %v1353_v0 = vld [vmem:[%s1346_s18] sm:$0xff]  ;;  %v1356_v1 = vld [vmem:[%s1346_s18 + $0x8] sm:$0xff]  ;;  %v1194_v60 = vmov 0.0   ;;  %vm1195_vm0 = vmmov 0   ;;  %vm391_vm1 = vcmask 130112  }
  0x3b   : > { %v1359_v2 = vld [vmem:[%s1346_s18 + $0x10] sm:$0xff]  ;;  %v330_v3 = vadd.f32 %v1356_v1, %v1353_v0  ;;  %v1364_v4 = vld [vmem:[%s1346_s18 + $0x18] sm:$0xff]  ;;  %v1367_v5 = vld [vmem:[%s1346_s18 + $0x80] sm:$0xff]  ;;  %990 = vmatprep.subr.mxu0 %v1194_v60  ;;  %1001 = vmatprep.subr.mxu1 %v1194_v60  ;;  %vm398_vm2 = vcmask 195712   ;;  %vm405_vm3 = vcmask 261312   ;;  %vm407_vm4 = vcmask 261120  }
  0x3c   : > { %v1371_v7 = vld [vmem:[%s1346_s18 + $0x88] sm:$0xff]  ;;  %v1374_v8 = vld [vmem:[%s1346_s18 + $0x90] sm:$0xff]  ;;  %v1377_v9 = vld [vmem:[%s1346_s18 + $0x20] sm:$0xff]  ;;  %998 = vmatprep.mubr.msk.f32.mxu0 %vm1195_vm0, %v1194_v60  ;;  %1003 = vmatprep.mubr.msk.f32.mxu1 %vm1195_vm0, %v1194_v60  ;;  %vm487_vm5 = vcmask 1041408   ;;  %vm483_vm6 = vcmask 15360   ;;  %s714_s30 = sld [smem:[#allocation2]] }
  0x3d   : > { %v331_v6 = vadd.f32 %v330_v3, %v1359_v2  ;;  %v348_v10 = vadd.f32 %v1371_v7, %v1367_v5  ;;  %v1383_v12 = vld [vmem:[%s1346_s18 + $0x98] sm:$0xff]  ;;  %v1386_v13 = vld [vmem:[%s1346_s18 + $0x40] sm:$0xff]  ;;  %v1389_v14 = vld [vmem:[%s1346_s18 + $0x48] sm:$0xff]  ;;  %s1579_s9 = scalar_lea.vmem [#allocation6], %s962_s17  ;;  %s982_s17 = sshll.u32 %s1264_s6, 12 }
  0x3e   : > { %1729 = vst [vmem:[#allocation9_spill] sm:$0xff] %v1383_v12  ;;  %v1392_v15 = vld [vmem:[%s1346_s18 + $0x28] sm:$0xff]  ;;  %v1396_v17 = vld [vmem:[%s1346_s18 + $0x50] sm:$0xff]  ;;  %v339_v18 = vadd.f32 %v1389_v14, %v1386_v13  ;;  %v1405_v21 = vld [vmem:[%s1346_s18 + $0xa0] sm:$0xff]  ;;  %s882_s12 = sshll.u32 %s1579_s9, 4  ;;  %s1654_s13 = scalar_lea.hbm %s1718_s7, %s982_s17  ;;  %s1656_s12 = int_to_ptr.vmem [resolvable:$true] %s882_s12 }
  0x3f   : > { %v332_v11 = vadd.f32 %v331_v6, %v1364_v4  ;;  %v349_v16 = vadd.f32 %v348_v10, %v1374_v8  ;;  %v1401_v19 = vld [vmem:[%s1346_s18 + $0x30] sm:$0xff]  ;;  %v1408_v22 = vld [vmem:[%s1346_s18 + $0x58] sm:$0xff]  ;;  %v1413_v25 = vld [vmem:[%s1346_s18 + $0xc0] sm:$0xff]  ;;  %v380_v6 = vlaneseq  ;;  %s869_s21 = scalar_lea.sflag [#allocation5], %s1340_s10  ;;  %s1125_s23 = scalar_lea.vmem %s1656_s12, 4096 }
  0x40   : > { %v340_v24 = vadd.f32 %v339_v18, %v1396_v17  ;;  %v1416_v26 = vld [vmem:[%s1346_s18 + $0xc8] sm:$0xff]  ;;  %v1419_v27 = vld [vmem:[%s1346_s18 + $0xd0] sm:$0xff]  ;;  %v1426_v30 = vld [vmem:[%s1346_s18 + $0x60] sm:$0xff]  ;;  %p1126_p11 = scmp.ne.s32.totalorder %s1656_s12, %s1125_s23  ;;  %p1733_p12 = scmp.ne.s32.totalorder %s1725_s14, 0 }
  0x41   : > { %v333_v20 = vadd.f32 %v332_v11, %v1377_v9  ;;  %v350_v23 = vadd.f32 %v349_v16, %v1383_v12  ;;  %v1423_v29 = vld [vmem:[%s1346_s18 + $0xa8] sm:$0xff]  ;;  %v357_v31 = vadd.f32 %v1416_v26, %v1413_v25  ;;  %v1431_v32 = vld [vmem:[%s1346_s18 + $0x38] sm:$0xff]  ;;  %v1440_v37 = vld [vmem:[%s1346_s18 + $0xb0] sm:$0xff]  ;;  %v381_v10 = vand.u32 127, %v380_v6  ;;  %s1197_s24 = smov [#allocation6]  }
  0x42   : > { %v341_v34 = vadd.f32 %v340_v24, %v1408_v22  ;;  %v1436_v35 = vld [vmem:[%s1346_s18 + $0xd8] sm:$0xff]  ;;  %v1443_v38 = vld [vmem:[%s1346_s18 + $0x68] sm:$0xff]  ;;  %v1449_v42 = vld [vmem:[%s1346_s18 + $0xe0] sm:$0xff]  ;;  %v383_v11 = vshrl.u32 %v380_v6, 7  ;;  %p1127_p13 = pnand %p1126_p11, %p1733_p12  ;;  %s1129_s25 = sshll.u32 %s1197_s24, 4  ;;  %s1130_s25 = int_to_ptr.vmem [resolvable:$false] %s1129_s25 }
  0x43   : > { %v334_v28 = vadd.f32 %v333_v20, %v1392_v15  ;;  %v351_v33 = vadd.f32 %v350_v23, %v1405_v21  ;;  %v358_v39 = vadd.f32 %v357_v31, %v1419_v27  ;;  %1730 = vst [vmem:[#allocation10_spill] sm:$0xff] %v1449_v42  ;;  %v1453_v44 = vld [vmem:[%s1346_s18 + $0xb8] sm:$0xff]  ;;  %v1456_v45 = vld [vmem:[%s1346_s18 + $0x70] sm:$0xff]  ;;  %v1462_v49 = vld [vmem:[%s1346_s18 + $0xe8] sm:$0xff]  ;;  %v386_v18 = vadd.s32 4294967288, %v381_v10  ;;  %s1131_s16 = scalar_lea.vmem %s1130_s25, 8192  ;;  %p1132_p5 = scmp.lt.s32.totalorder %s1656_s12, %s1130_s25 }
  0x44   : > { %v342_v41 = vadd.f32 %v341_v34, %v1426_v30  ;;  %v1465_v50 = vld [vmem:[%s1346_s18 + $0x78] sm:$0xff]  ;;  %v1471_v54 = vld [vmem:[%s1346_s18 + $0xf0] sm:$0xff]  ;;  %v372_v63 = vld [vmem:[%s1712_s1 + $0x8] sm:$0xff]  ;;  %v393_v20 = vadd.s32 4294967280, %v381_v10  ;;  %v400_v24 = vadd.s32 4294967272, %v381_v10  ;;  %p1128_p4 = pneg %p1127_p13  ;;  %p1133_p7 = scmp.lt.s32.totalorder %s1131_s16, %s1125_s23 }
  0x45   : > { %v335_v36 = vadd.f32 %v334_v28, %v1401_v19  ;;  %v352_v40 = vadd.f32 %v351_v33, %v1423_v29  ;;  %v359_v46 = vadd.f32 %v358_v39, %v1436_v35  ;;  %v1476_v57 = vld [vmem:[%s1346_s18 + $0xf8] sm:$0xff]  ;;  %v373_v62 = vld [vmem:[%s1712_s1 + $0x10] sm:$0xff]  ;;  %v371_v3 = vld [vmem:[%s1712_s1] sm:$0xff]  ;;  %v384_v28 = vsub.s32 %v381_v10, %v383_v11 }
  0x46   : > { %v343_v48 = vadd.f32 %v342_v41, %v1443_v38  ;;  %v374_v61 = vld [vmem:[%s1712_s1 + $0x18] sm:$0xff]  ;;  %v389_v33 = vsub.s32 %v386_v18, %v383_v11  ;;  %v396_v34 = vsub.s32 %v393_v20, %v383_v11  ;;  %v403_v41 = vsub.s32 %v400_v24, %v383_v11  ;;  %v482_v20 = vld [vmem:[%s1715_s4] sm:$0x1]  ;;  %p1134_p8 = por %p1133_p7, %p1132_p5 }
  0x47   : > { %v336_v43 = vadd.f32 %v335_v36, %v1431_v32  ;;  %v353_v47 = vadd.f32 %v352_v40, %v1440_v37  ;;  %v360_v51 = vadd.f32 %v359_v46, %v1449_v42  ;;  %991 = vmatpush3.msra.mxu0 %v374_v61  ;;  %v1196_v61 = vmov 0  }
  0x48   : > { %v344_v53 = vadd.f32 %v343_v48, %v1456_v45  ;;  %992 = vmatprep.subr.mxu0 %v1194_v60  ;;  %1060 = vset.pattern.permute.xlu1 %v1196_v61  ;;  %p1135_p10 = pnand %p1134_p8, %p1128_p4 }
  0x49   : > { %337 = vadd.xlane.f32.xlu0 %v336_v43  ;;  %v354_v52 = vadd.f32 %v353_v47, %v1453_v44  ;;  %v361_v55 = vadd.f32 %v360_v51, %v1462_v49  ;;  %993 = vmatpush3.msra.mxu0 %v373_v62  ;;  %v588_v62 = vld [vmem:[%s1716_s5 + $0x10] sm:$0xff] }
  0x4a   : > { %v345_v56 = vadd.f32 %v344_v53, %v1465_v50  ;;  %994 = vmatprep.subr.mxu0 %v1194_v60  ;;  %1059 = vset.pattern.permute.xlu0 %v1196_v61 }
  0x4b   : > { %355 = vadd.xlane.f32.xlu1 %v354_v52  ;;  %v362_v58 = vadd.f32 %v361_v55, %v1471_v54  ;;  %995 = vmatpush3.msra.mxu0 %v372_v63  ;;  %v589_v63 = vld [vmem:[%s1716_s5 + $0x18] sm:$0xff] }
  0x4c   : > { %996 = vmatprep.subr.mxu0 %v1194_v60  ;;  %v586_v60 = vld [vmem:[%s1716_s5] sm:$0xff] }
  0x4d   : > { %346 = vadd.xlane.f32.xlu0 %v345_v56  ;;  %v363_v59 = vadd.f32 %v362_v58, %v1476_v57  ;;  %997 = vmatpush3.msra.mxu0 %v371_v3  ;;  %v481_v58 = vld [vmem:[%s1714_s3] sm:$0x3] }
  0x4e   : > { %1002 = vmatpush3.msk.msra.mxu1 %vm487_vm5, %v481_v58  ;;  %v375_v3 = vld [vmem:[%s1713_s2] sm:$0x1] }
  0x4f   : > { %364 = vadd.xlane.f32.xlu1 %v363_v59  ;;  %v587_v59 = vld [vmem:[%s1716_s5 + $0x8] sm:$0xff] }
  0x60   : > { %597 = vperm.xlu1 %1060, %v587_v59  }
  0x63   : > { %592 = vperm.xlu0 %1059, %v586_v60  }
  0x64   : > { %602 = vperm.xlu1 %1060, %v588_v62  }
  0x68   : > { %607 = vperm.xlu1 %1060, %v589_v63  }
  0xd2   : > { %v338_v16 = vpop.xlane.xlu0 %337 }
  0xd3   : > { %v367_v31 = vmul.f32 0.0009765625, %v338_v16 }
  0xd4   : > { %v356_v23 = vpop.xlane.xlu1 %355 }
  0xd5   : > { %v369_v36 = vmul.f32 0.0009765625, %v356_v23  ;;  %v385_v43 = vrot.slane %v367_v31, %v384_v28 }
  0xd6   : > { %v347_v39 = vpop.xlane.xlu0 %346 }
  0xd7   : > { %v368_v40 = vmul.f32 0.0009765625, %v347_v39  ;;  %v397_v48 = vrot.slane %v369_v36, %v396_v34  ;;  %v569_v36 = vsub.s32 0, %v383_v11 }
  0xd8   : > { %v365_v47 = vpop.xlane.xlu1 %364 }
  0xd9   : > { %v390_v46 = vrot.slane %v368_v40, %v389_v33  ;;  %v370_v51 = vmul.f32 0.0009765625, %v365_v47 }
  0xdb   : > { %v392_v52 = vsel %vm391_vm1, %v390_v46, %v385_v43  ;;  %v404_v53 = vrot.slane %v370_v51, %v403_v41 }
  0xdc   : > { %v399_v55 = vsel %vm398_vm2, %v397_v48, %v392_v52  ;;  %v598_v41 = vpop.permute.xlu1 %597 }
  0xdd   : > { %v406_v56 = vsel %vm405_vm3, %v404_v53, %v399_v55  ;;  %v618_v47 = vmul.f32 %v598_v41, %v1386_v13  ;;  %v619_v51 = vmul.f32 %v598_v41, %v1389_v14  ;;  %v620_v53 = vmul.f32 %v598_v41, %v1396_v17 }
  0xde   : > { %999 = vmatmul.mubr.msk.f32.vlgmr.msra.gmra.mxu0 %vm407_vm4, %v406_v56  ;;  %v593_v43 = vpop.permute.xlu0 %592  ;;  %v621_v55 = vmul.f32 %v598_v41, %v1408_v22  ;;  %v622_v59 = vmul.f32 %v598_v41, %v1426_v30  ;;  %v623_v63 = vmul.f32 %v598_v41, %v1443_v38 }
  0xdf   : > { %v610_v48 = vmul.f32 %v593_v43, %v1353_v0  ;;  %v611_v52 = vmul.f32 %v593_v43, %v1356_v1  ;;  %v612_v11 = vmul.f32 %v593_v43, %v1359_v2  ;;  %v613_v56 = vmul.f32 %v593_v43, %v1364_v4 }
  0xe0   : > { %v603_v46 = vpop.permute.xlu1 %602  ;;  %v614_v60 = vmul.f32 %v593_v43, %v1377_v9 }
  0xe1   : > { %v626_v58 = vmul.f32 %v603_v46, %v1367_v5  ;;  %v642_v61 = vadd.f32 %v618_v47, %v610_v48  ;;  %v627_v62 = vmul.f32 %v603_v46, %v1371_v7  ;;  %v631_v47 = vmul.f32 %v603_v46, %v1423_v29 }
 0x19e   : > { %v476_v6 = vpop.f32.mrf.mxu0 }
 0x19f   : > { %v477_v10 = vadd.f32 %v476_v6, %v375_v3  ;;  %v615_v3 = vmul.f32 %v593_v43, %v1392_v15  ;;  %v651_v6 = vadd.f32 %v619_v51, %v611_v52 }
 0x1a0   : > { %v1000_v16 = vpop.f32.mrf.mxu0 }
 0x1a1   : > { %v480_v18 = vmax.f32 %v477_v10, 0.0  ;;  %v608_v10 = vpop.permute.xlu1 %607  ;;  %v628_v16 = vmul.f32 %v603_v46, %v1374_v8  ;;  %v652_v48 = vadd.f32 %v651_v6, %v627_v62  ;;  %v687_v51 = vadd.f32 %v623_v63, %v615_v3 }
 0x1a2   : > { %v635_v52 = vmul.f32 %v608_v10, %v1416_v26  ;;  %v639_v63 = vmul.f32 %v608_v10, %v1462_v49 }
 0x1a3   : > { %1004 = vmatmul.mubr.msk.f32.vlgmr.msra.gmra.mxu1 %vm483_vm6, %v480_v18  ;;  %v624_v18 = vmul.f32 %v598_v41, %v1456_v45  ;;  %v688_v62 = vadd.f32 %v687_v51, %v631_v47 }
 0x1a4   : > { %v653_v3 = vadd.f32 %v652_v48, %v635_v52 }
 0x263   : > { %v557_v23 = vpop.f32.mrf.mxu1 }
 0x264   : > { %v558_v24 = vadd.f32 %v557_v23, %v482_v20  ;;  %v616_v20 = vmul.f32 %v593_v43, %v1401_v19  ;;  %v660_v23 = vadd.f32 %v620_v53, %v612_v11  ;;  %v632_v53 = vmul.f32 %v603_v46, %v1440_v37 }
 0x265   : > { %v1005_v28 = vpop.f32.mrf.mxu1 }
 0x266   : > { %v967_v31 = vmul.f32 -1.442695, %v558_v24  ;;  %v629_v24 = vmul.f32 %v603_v46, %v1383_v12  ;;  %v625_v28 = vmul.f32 %v598_v41, %v1465_v50  ;;  %v661_v11 = vadd.f32 %v660_v23, %v628_v16 }
 0x267   : > { %v696_v12 = vadd.f32 %v624_v18, %v616_v20  ;;  %v636_v41 = vmul.f32 %v608_v10, %v1419_v27  ;;  %v640_v16 = vmul.f32 %v608_v10, %v1471_v54  ;;  %v641_v23 = vmul.f32 %v608_v10, %v1476_v57 }
 0x268   : > { %1061 = vpow2.f32 %v967_v31  ;;  %v617_v31 = vmul.f32 %v593_v43, %v1431_v32  ;;  %v633_v43 = vmul.f32 %v603_v46, %v1453_v44 }
 0x269   : > { %v697_v6 = vadd.f32 %v696_v12, %v632_v53  ;;  %v662_v18 = vadd.f32 %v661_v11, %v636_v41 }
 0x275   : > { %v1062_v33 = vpop.eup %1061 }
 0x276   : > { %v564_v34 = vadd.f32 1.0, %v1062_v33  ;;  %v669_v33 = vadd.f32 %v621_v55, %v613_v56  ;;  %v705_v56 = vadd.f32 %v625_v28, %v617_v31  ;;  %v654_v31 = vrot.slane %v653_v3, 4 }
 0x278   : > { %1063 = vrcp.f32 %v564_v34  ;;  %v630_v34 = vmul.f32 %v603_v46, %v1405_v21  ;;  %v670_v55 = vadd.f32 %v669_v33, %v629_v24  ;;  %v706_v20 = vadd.f32 %v705_v56, %v633_v43 }
 0x279   : > { %v689_v33 = vadd.f32 %v688_v62, %v639_v63  ;;  %v655_v51 = vadd.f32 %v654_v31, %v653_v3 }
 0x27b   : > { %v690_v48 = vrot.slane %v689_v33, 4 }
 0x285   : > { %v1064_v39 = vpop.eup %1063 }
 0x286   : > { %v570_v40 = vrot.slane %v1064_v39, %v569_v36  ;;  %v643_v36 = vadd.f32 %v642_v61, %v626_v58  ;;  %v678_v39 = vadd.f32 %v622_v59, %v614_v60  ;;  %v637_v58 = vmul.f32 %v608_v10, %v1436_v35 }
 0x287   : > { %v638_v60 = vmul.f32 %v608_v10, %v1449_v42 }
 0x288   : > { %572 = vbcast.lane.b32.xlu1 %v570_v40, 256  ;;  %v679_v59 = vadd.f32 %v678_v39, %v630_v34  ;;  %v671_v46 = vadd.f32 %v670_v55, %v637_v58  ;;  %v663_v34 = vrot.slane %v662_v18, 4  ;;  %v698_v39 = vadd.f32 %v697_v6, %v640_v16 }
 0x289   : > { %v691_v55 = vadd.f32 %v690_v48, %v689_v33 }
 0x28a   : > { %v680_v28 = vadd.f32 %v679_v59, %v638_v60  ;;  %v672_v42 = vrot.slane %v671_v46, 4  ;;  %v664_v12 = vadd.f32 %v663_v34, %v662_v18  ;;  %v699_v52 = vrot.slane %v698_v39, 4 }
 0x28c   : > { %576 = vbcast.lane.b32.xlu1 %v570_v40, 264  ;;  %v681_v47 = vrot.slane %v680_v28, 4  ;;  %v673_v53 = vadd.f32 %v672_v42, %v671_v46  ;;  %v665_v56 = vrot.slane %v664_v12, 2  ;;  %v700_v58 = vadd.f32 %v699_v52, %v698_v39 }
 0x28e   : > { %v682_v43 = vadd.f32 %v681_v47, %v680_v28  ;;  %v674_v59 = vrot.slane %v673_v53, 2  ;;  %v666_v16 = vadd.f32 %v665_v56, %v664_v12  ;;  %v701_v3 = vrot.slane %v700_v58, 2 }
 0x290   : > { %580 = vbcast.lane.b32.xlu1 %v570_v40, 272  ;;  %v683_v63 = vrot.slane %v682_v43, 2  ;;  %v667_v28 = vrot.slane %v666_v16, 1  ;;  %v702_v31 = vadd.f32 %v701_v3, %v700_v58 }
 0x292   : > { %v684_v42 = vadd.f32 %v683_v63, %v682_v43  ;;  %v668_v52 = vadd.f32 %v667_v28, %v666_v16 }
 0x294   : > { %584 = vbcast.lane.b32.xlu1 %v570_v40, 280  ;;  %v634_v40 = vmul.f32 %v608_v10, %v1413_v25  ;;  %v656_v10 = vrot.slane %v655_v51, 2  ;;  %v685_v47 = vrot.slane %v684_v42, 1 }
 0x296   : > { %v644_v61 = vadd.f32 %v643_v36, %v634_v40  ;;  %v707_v36 = vadd.f32 %v706_v20, %v641_v23  ;;  %v657_v6 = vadd.f32 %v656_v10, %v655_v51  ;;  %v675_v20 = vadd.f32 %v674_v59, %v673_v53 }
 0x297   : > { %v703_v51 = vrot.slane %v702_v31, 1 }
 0x298   : > { %v645_v24 = vrot.slane %v644_v61, 4  ;;  %v708_v11 = vrot.slane %v707_v36, 4  ;;  %v658_v46 = vrot.slane %v657_v6, 1  ;;  %v676_v33 = vrot.slane %v675_v20, 1 }
 0x299   : > { %v704_v43 = vadd.f32 %v703_v51, %v702_v31 }
 0x29a   : > { %v646_v40 = vadd.f32 %v645_v24, %v644_v61  ;;  %v709_v60 = vadd.f32 %v708_v11, %v707_v36  ;;  %v692_v61 = vrot.slane %v691_v55, 2  ;;  %v715_v36 = vstv %s714_s30 }
 0x29b   : > { %v677_v11 = vadd.f32 %v676_v33, %v675_v20  ;;  %v718_v59 = vadd.f32 %v715_v36, %v668_v52  ;;  %v722_v3 = vadd.f32 %v715_v36, %v704_v43 }
 0x29c   : > { %v647_v41 = vrot.slane %v646_v40, 2  ;;  %v710_v18 = vrot.slane %v709_v60, 2  ;;  %v693_v24 = vadd.f32 %v692_v61, %v691_v55 }
 0x29d   : > { %v719_v63 = vadd.f32 %v715_v36, %v677_v11 }
 0x29e   : > { %v648_v62 = vadd.f32 %v647_v41, %v646_v40  ;;  %v711_v34 = vadd.f32 %v710_v18, %v709_v60  ;;  %v659_v40 = vadd.f32 %v658_v46, %v657_v6  ;;  %v694_v48 = vrot.slane %v693_v24, 1 }
 0x29f   : > { %v686_v41 = vadd.f32 %v685_v47, %v684_v42  ;;  %v970_v18 = vmul.f32 -1.442695, %v718_v59  ;;  %v974_v42 = vmul.f32 -1.442695, %v722_v3 }
 0x2a0   : > { %v649_v23 = vrot.slane %v648_v62, 1  ;;  %v712_v12 = vrot.slane %v711_v34, 1  ;;  %v695_v10 = vadd.f32 %v694_v48, %v693_v24  ;;  %v717_v56 = vadd.f32 %v715_v36, %v659_v40 }
 0x2a1   : > { %v720_v58 = vadd.f32 %v715_v36, %v686_v41 }
 0x2a2   : > { %v650_v39 = vadd.f32 %v649_v23, %v648_v62  ;;  %v713_v55 = vadd.f32 %v712_v12, %v711_v34  ;;  %v721_v60 = vadd.f32 %v715_v36, %v695_v10  ;;  %v969_v62 = vmul.f32 -1.442695, %v717_v56 }
 0x2a3   : > { %v971_v23 = vmul.f32 -1.442695, %v719_v63  ;;  %v972_v16 = vmul.f32 -1.442695, %v720_v58 }
 0x2a4   : > { %v716_v53 = vadd.f32 %v715_v36, %v650_v39  ;;  %v723_v6 = vadd.f32 %v715_v36, %v713_v55  ;;  %v973_v20 = vmul.f32 -1.442695, %v721_v60 }
 0x2a6   : > { %v968_v61 = vmul.f32 -1.442695, %v716_v53  ;;  %v975_v46 = vmul.f32 -1.442695, %v723_v6 }
 0x2a8   : > { %1065 = vpow2.f32 %v968_v61 }
 0x2a9   : > { %1067 = vpow2.f32 %v969_v62 }
 0x2aa   : > { %1069 = vpow2.f32 %v970_v18 }
 0x2ab   : > { %1071 = vpow2.f32 %v971_v23 }
 0x2ac   : > { %1073 = vpow2.f32 %v972_v16 }
 0x2ad   : > { %1075 = vpow2.f32 %v973_v20 }
 0x2ae   : > { %1077 = vpow2.f32 %v974_v42 }
 0x2af   : > { %1079 = vpow2.f32 %v975_v46 }
 0x2b5   : > { %v1066_v24 = vpop.eup %1065 }
 0x2b6   : > { %v1068_v28 = vpop.eup %1067  ;;  %v748_v34 = vadd.f32 1.0, %v1066_v24 }
 0x2b7   : > { %v1070_v31 = vpop.eup %1069  ;;  %v749_v47 = vadd.f32 1.0, %v1068_v28 }
 0x2b8   : > { %v1072_v33 = vpop.eup %1071  ;;  %v750_v40 = vadd.f32 1.0, %v1070_v31  ;;  %1081 = vrcp.f32 %v748_v34 }
 0x2b9   : > { %v1074_v39 = vpop.eup %1073  ;;  %v751_v52 = vadd.f32 1.0, %v1072_v33  ;;  %1083 = vrcp.f32 %v749_v47 }
 0x2ba   : > { %v1076_v36 = vpop.eup %1075  ;;  %v752_v11 = vadd.f32 1.0, %v1074_v39  ;;  %1085 = vrcp.f32 %v750_v40 }
 0x2bb   : > { %v1078_v48 = vpop.eup %1077  ;;  %v753_v12 = vadd.f32 1.0, %v1076_v36  ;;  %1087 = vrcp.f32 %v751_v52 }
 0x2bc   : > { %v1080_v51 = vpop.eup %1079  ;;  %v754_v41 = vadd.f32 1.0, %v1078_v48  ;;  %1089 = vrcp.f32 %v752_v11 }
 0x2bd   : > { %v755_v53 = vadd.f32 1.0, %v1080_v51  ;;  %1091 = vrcp.f32 %v753_v12 }
 0x2be   : > { %1093 = vrcp.f32 %v754_v41 }
 0x2bf   : > { %1095 = vrcp.f32 %v755_v53 }
 0x2c5   : > { %v1545_v10 = vpop.eup %1081 }
 0x2c6   : > { %v1547_v56 = vpop.eup %1083 }
 0x2c7   : > { %v1549_v43 = vpop.eup %1085 }
 0x2c8   : > { %v1551_v59 = vpop.eup %1087 }
 0x2c9   : > { %v1553_v55 = vpop.eup %1089 }
 0x2ca   : > { %v1555_v63 = vpop.eup %1091 }
 0x2cb   : > { %v1557_v58 = vpop.eup %1093 }
 0x2cc   : > { %v1559_v60 = vpop.eup %1095 }
 0x2fa   : > { %v573_v61 = vpop.permute.xlu1 %572 }
 0x2fb   : > { %v772_v62 = vadd.f32 %v1545_v10, %v573_v61  ;;  %v773_v3 = vadd.f32 %v1547_v56, %v573_v61  ;;  %v774_v18 = vadd.f32 %v1549_v43, %v573_v61  ;;  %v775_v6 = vadd.f32 %v1551_v59, %v573_v61 }
 0x2fc   : > { %v776_v23 = vadd.f32 %v1553_v55, %v573_v61  ;;  %v777_v16 = vadd.f32 %v1555_v63, %v573_v61  ;;  %v778_v20 = vadd.f32 %v1557_v58, %v573_v61  ;;  %v779_v42 = vadd.f32 %v1559_v60, %v573_v61 }
 0x2fd   : > { %v804_v46 = vmul.f32 %v772_v62, %v1353_v0  ;;  %v805_v24 = vmul.f32 %v773_v3, %v1356_v1  ;;  %v806_v28 = vmul.f32 %v774_v18, %v1359_v2  ;;  %v807_v31 = vmul.f32 %v775_v6, %v1364_v4  ;;  %v1731_v6 = vld [vmem:[#allocation9_spill] sm:$0xff] }
 0x2fe   : > { %v808_v33 = vmul.f32 %v776_v23, %v1377_v9  ;;  %v809_v34 = vmul.f32 %v777_v16, %v1392_v15  ;;  %v810_v39 = vmul.f32 %v778_v20, %v1401_v19  ;;  %v811_v47 = vmul.f32 %v779_v42, %v1431_v32  ;;  %v577_v36 = vpop.permute.xlu1 %576 }
 0x2ff   : > { %836 = vst [vmem:[%s1579_s9] sm:$0xff] %v804_v46  ;;  %837 = vst [vmem:[%s1579_s9 + $0x8] sm:$0xff] %v805_v24  ;;  %v780_v0 = vadd.f32 %v1545_v10, %v577_v36  ;;  %v781_v1 = vadd.f32 %v1547_v56, %v577_v36  ;;  %v782_v2 = vadd.f32 %v1549_v43, %v577_v36 }
 0x300   : > { %838 = vst [vmem:[%s1579_s9 + $0x10] sm:$0xff] %v806_v28  ;;  %839 = vst [vmem:[%s1579_s9 + $0x18] sm:$0xff] %v807_v31  ;;  %v783_v4 = vadd.f32 %v1551_v59, %v577_v36  ;;  %v784_v9 = vadd.f32 %v1553_v55, %v577_v36  ;;  %v785_v15 = vadd.f32 %v1555_v63, %v577_v36 }
 0x301   : > { %840 = vst [vmem:[%s1579_s9 + $0x20] sm:$0xff] %v808_v33  ;;  %841 = vst [vmem:[%s1579_s9 + $0x28] sm:$0xff] %v809_v34  ;;  %v786_v19 = vadd.f32 %v1557_v58, %v577_v36  ;;  %v787_v32 = vadd.f32 %v1559_v60, %v577_v36  ;;  %v812_v40 = vmul.f32 %v780_v0, %v1386_v13 }
 0x302   : > { %842 = vst [vmem:[%s1579_s9 + $0x30] sm:$0xff] %v810_v39  ;;  %843 = vst [vmem:[%s1579_s9 + $0x38] sm:$0xff] %v811_v47  ;;  %v813_v48 = vmul.f32 %v781_v1, %v1389_v14  ;;  %v814_v52 = vmul.f32 %v782_v2, %v1396_v17  ;;  %v815_v51 = vmul.f32 %v783_v4, %v1408_v22  ;;  %v581_v61 = vpop.permute.xlu1 %580 }
 0x303   : > { %v816_v11 = vmul.f32 %v784_v9, %v1426_v30  ;;  %v817_v12 = vmul.f32 %v785_v15, %v1443_v38  ;;  %v818_v41 = vmul.f32 %v786_v19, %v1456_v45  ;;  %v819_v53 = vmul.f32 %v787_v32, %v1465_v50  ;;  %844 = vst [vmem:[%s1579_s9 + $0x40] sm:$0xff] %v812_v40 }
 0x304   : > { %845 = vst [vmem:[%s1579_s9 + $0x48] sm:$0xff] %v813_v48  ;;  %846 = vst [vmem:[%s1579_s9 + $0x50] sm:$0xff] %v814_v52  ;;  %v788_v13 = vadd.f32 %v1545_v10, %v581_v61  ;;  %v789_v14 = vadd.f32 %v1547_v56, %v581_v61  ;;  %v790_v17 = vadd.f32 %v1549_v43, %v581_v61 }
 0x305   : > { %847 = vst [vmem:[%s1579_s9 + $0x58] sm:$0xff] %v815_v51  ;;  %v791_v22 = vadd.f32 %v1551_v59, %v581_v61  ;;  %848 = vst [vmem:[%s1579_s9 + $0x60] sm:$0xff] %v816_v11  ;;  %v792_v30 = vadd.f32 %v1553_v55, %v581_v61  ;;  %v793_v38 = vadd.f32 %v1555_v63, %v581_v61 }
 0x306   : > { %849 = vst [vmem:[%s1579_s9 + $0x68] sm:$0xff] %v817_v12  ;;  %850 = vst [vmem:[%s1579_s9 + $0x70] sm:$0xff] %v818_v41  ;;  %v794_v45 = vadd.f32 %v1557_v58, %v581_v61  ;;  %v795_v50 = vadd.f32 %v1559_v60, %v581_v61  ;;  %v820_v62 = vmul.f32 %v788_v13, %v1367_v5  ;;  %v585_v24 = vpop.permute.xlu1 %584 }
 0x307   : > { %851 = vst [vmem:[%s1579_s9 + $0x78] sm:$0xff] %v819_v53  ;;  %v821_v3 = vmul.f32 %v789_v14, %v1371_v7  ;;  %v822_v18 = vmul.f32 %v790_v17, %v1374_v8  ;;  %v823_v23 = vmul.f32 %v791_v22, %v1731_v6  ;;  %v824_v16 = vmul.f32 %v792_v30, %v1405_v21 }
 0x308   : > { %v825_v20 = vmul.f32 %v793_v38, %v1423_v29  ;;  %v826_v42 = vmul.f32 %v794_v45, %v1440_v37  ;;  %v827_v46 = vmul.f32 %v795_v50, %v1453_v44  ;;  %852 = vst [vmem:[%s1579_s9 + $0x80] sm:$0xff] %v820_v62  ;;  %v796_v5 = vadd.f32 %v1545_v10, %v585_v24 }
 0x309   : > { %853 = vst [vmem:[%s1579_s9 + $0x88] sm:$0xff] %v821_v3  ;;  %854 = vst [vmem:[%s1579_s9 + $0x90] sm:$0xff] %v822_v18  ;;  %v797_v7 = vadd.f32 %v1547_v56, %v585_v24  ;;  %v798_v8 = vadd.f32 %v1549_v43, %v585_v24  ;;  %v799_v21 = vadd.f32 %v1551_v59, %v585_v24 }
 0x30a   : > { %855 = vst [vmem:[%s1579_s9 + $0x98] sm:$0xff] %v823_v23  ;;  %856 = vst [vmem:[%s1579_s9 + $0xa0] sm:$0xff] %v824_v16  ;;  %v800_v29 = vadd.f32 %v1553_v55, %v585_v24  ;;  %v801_v37 = vadd.f32 %v1555_v63, %v585_v24  ;;  %v802_v44 = vadd.f32 %v1557_v58, %v585_v24  ;;  %v1732_v63 = vld [vmem:[#allocation10_spill] sm:$0xff] }
 0x30b   : > { %857 = vst [vmem:[%s1579_s9 + $0xa8] sm:$0xff] %v825_v20  ;;  %858 = vst [vmem:[%s1579_s9 + $0xb0] sm:$0xff] %v826_v42  ;;  %v803_v10 = vadd.f32 %v1559_v60, %v585_v24  ;;  %v828_v56 = vmul.f32 %v796_v5, %v1413_v25  ;;  %v829_v43 = vmul.f32 %v797_v7, %v1416_v26 }
 0x30c   : > { %859 = vst [vmem:[%s1579_s9 + $0xb8] sm:$0xff] %v827_v46  ;;  %v830_v59 = vmul.f32 %v798_v8, %v1419_v27  ;;  %v831_v55 = vmul.f32 %v799_v21, %v1436_v35  ;;  %v832_v25 = vmul.f32 %v800_v29, %v1732_v63  ;;  %v833_v26 = vmul.f32 %v801_v37, %v1462_v49 }
 0x30d   : > { %v834_v58 = vmul.f32 %v802_v44, %v1471_v54  ;;  %v835_v27 = vmul.f32 %v803_v10, %v1476_v57  ;;  %860 = vst [vmem:[%s1579_s9 + $0xc0] sm:$0xff] %v828_v56  ;;  %861 = vst [vmem:[%s1579_s9 + $0xc8] sm:$0xff] %v829_v43 }
 0x30e   : > { %862 = vst [vmem:[%s1579_s9 + $0xd0] sm:$0xff] %v830_v59  ;;  %863 = vst [vmem:[%s1579_s9 + $0xd8] sm:$0xff] %v831_v55 }
 0x30f   : > { %864 = vst [vmem:[%s1579_s9 + $0xe0] sm:$0xff] %v832_v25  ;;  %865 = vst [vmem:[%s1579_s9 + $0xe8] sm:$0xff] %v833_v26 }
 0x310   : > { %866 = vst [vmem:[%s1579_s9 + $0xf0] sm:$0xff] %v834_v58  ;;  %867 = vst [vmem:[%s1579_s9 + $0xf8] sm:$0xff] %v835_v27 }
 0x311   : > { %1138 = shalt.err (!%p1135_p10)
}
 0x312   : > { %s1139_s19 = scalar_lea.hbm %s1654_s13, 4096  ;;  %s1143_s30 = scalar_lea.hbm %s1718_s7, 8192 }
 0x313   : > { %p1140_p0 = scmp.ne.s32.totalorder %s1654_s13, %s1139_s19  ;;  %p1144_p1 = scmp.lt.s32.totalorder %s1654_s13, %s1718_s7 }
 0x314   : > { %p1145_p3 = scmp.lt.s32.totalorder %s1143_s30, %s1139_s19 }
 0x315   : > { %p1141_p2 = pnand %p1140_p0, %p1733_p12 }
 0x316   : > { %p1146_p6 = por %p1145_p3, %p1144_p1 }
 0x317   : > { %p1142_p9 = pneg %p1141_p2 }
 0x319   : > { %p1147_p11 = pnand %p1146_p6, %p1142_p9 }
 0x31b   : > { %1150 = shalt.err (!%p1147_p11)
}
 0x31c   : > { %s1198_s6 = smov 1024   ;;  %s1199_s18 = smov 64  }
 0x31d   : > { %1008 = dma.vmem_to_hbm [thread:$0]  (%p1733_p12), %s1656_s12, 4096, %s1654_s13, %s869_s21, %s1198_s6, %s1198_s6, %s1199_s18  }
 0x31e PF: > { %s897_s23 = sand.u32 1, %s1177_s26   ;;  %p1734_p13 = scmp.ne.s32.totalorder %s1726_s15, 0 }
 0x31f   : > { %p1735_p4 = scmp.ge.s32.totalorder %s1189_s29, 2  ;;  %s898_s24 = scalar_lea.sflag [#allocation5], %s897_s23 }
 0x321   : > { %p1015_p5 = pnand %p1735_p4, %p1734_p13 }
 0x323   : > { %p1016_p7 = pneg %p1015_p5 }
 0x325   : > { %1172 = dma.done.wait (%p1016_p7), %s898_s24, 4096  }
 0x326   : > { %1174 = vsyncadd (%p1016_p7), %s898_s24, 4294963200  ;;  %p21_p8 = scmp.ge.s32.totalorder %s1268_s8, 4   ;;  %s1736_s26 = smov %s1181_s27 }
 0x327   : > { %s1737_s27 = smov %s1185_s28  ;;  %s1738_s28 = smov %s1280_s11 }
 0x328   : > { %s1739_s29 = smov %s1268_s8  ;;  %23 = sbr.rel (!%p21_p8) target bundleno = 7 (0x7), region = 93 }
 0x32d   :  { %903 = vsyncpa [#allocation4], 1 }
 0x32e   :  { %905 = vsyncpa [#allocation4 + $0x1], 1 }
 0x32f   :  { %906 = vsyncpa [#allocation5], 1 }
 0x330   :  { %908 = vsyncpa [#allocation5 + $0x1], 1 }

</bundles_post_ra>
